<compile_context>
chip_gen: v6e
topology: v6e:2x2x1
jax: 0.10.0
libtpu: 0.0.40
codegen_flags: <defaults>
</compile_context>

<pallas_src>
import functools

import jax
import jax.numpy as jnp
from jax.experimental import pallas as pl
from jax.experimental.pallas import tpu as pltpu


def get_relative_positions(window_size):
    """JAX port of the PyTorch helper (log-spaced relative coordinates)."""
    coords_h = jnp.arange(window_size)
    coords_w = jnp.arange(window_size)
    gh, gw = jnp.meshgrid(coords_h, coords_w, indexing="ij")
    coords = jnp.stack([gh, gw])                                   # [2, ws, ws]
    coords_flatten = coords.reshape(2, -1)                         # [2, N]
    rel = coords_flatten[:, :, None] - coords_flatten[:, None, :]  # [2, N, N]
    rel = jnp.transpose(rel, (1, 2, 0)).astype(jnp.float32)        # [N, N, 2]
    return jnp.sign(rel) * jnp.log1p(jnp.abs(rel))


def _meta_bias_kernel(rp_t_ref, w1_ref, b1_ref, w2_ref, b2_ref, o_ref):
    # rp_t_ref: [2, N*N], w1_ref: [Dh, 2], b1_ref: [Dh, 1],
    # w2_ref:   [H, Dh],  b2_ref: [H, 1],  o_ref: [H, N*N]  (lane-dense output)
    rp_t = rp_t_ref[...]
    w1 = w1_ref[...]
    # Linear(2 -> Dh), transposed orientation: contraction length is only 2, so
    # expand it as two rank-1 broadcast updates on the VPU instead of a
    # degenerate MXU matmul.
    hidden_t = w1[:, 0:1] * rp_t[0:1, :] + w1[:, 1:2] * rp_t[1:2, :] + b1_ref[...]
    hidden_t = jnp.maximum(hidden_t, 0.0)                          # ReLU, [Dh, NN]
    out = jnp.dot(w2_ref[...], hidden_t,
                  preferred_element_type=jnp.float32) + b2_ref[...]
    o_ref[...] = out.astype(o_ref.dtype)                           # [H, NN]


def _window_attention_kernel(qkv_ref, bias_ref, o_ref, *,
                             num_heads, head_dim, scale):
    # qkv_ref : [Bt, N, 3*dim]   (Bt windows per grid step)
    # bias_ref: [H, N, N] f32    (resident across all grid steps)
    # o_ref   : [Bt, N, dim]
    Bt, N, _ = qkv_ref.shape
    dim = num_heads * head_dim
    x = qkv_ref[...]
    bias = bias_ref[...]

    # Split q/k/v per head with static lane slices and merge (head, window)
    # into a single leading batch axis: ONE batched QK^T, ONE softmax body and
    # ONE batched PV matmul per grid step (instead of a per-head unrolled loop).
    def gather_heads(base):
        return jnp.concatenate(
            [x[:, :, base + h * head_dim: base + (h + 1) * head_dim]
             for h in range(num_heads)],
            axis=0)                                                # [H*Bt, N, hd]

    q = gather_heads(0)
    k = gather_heads(dim)
    v = gather_heads(2 * dim)
    q = q * scale                          # weak-typed: stays in the input dtype

    attn = jnp.einsum("zqd,zkd->zqk", q, k,
                      preferred_element_type=jnp.float32)          # [H*Bt, N, N]
    attn = attn.reshape(num_heads, Bt, N, N) + bias[:, None, :, :]
    attn = attn - jnp.max(attn, axis=-1, keepdims=True)
    e = jnp.exp(attn)
    inv = pl.reciprocal(jnp.sum(e, axis=-1, keepdims=True), approx=True)  # EUP
    p = (e * inv).reshape(num_heads * Bt, N, N).astype(v.dtype)

    out = jnp.einsum("zqk,zkd->zqd", p, v,
                     preferred_element_type=jnp.float32)           # [H*Bt, N, hd]
    # Re-concatenate heads along the feature axis (head-major, matches torch).
    out = jnp.concatenate(
        [out[h * Bt:(h + 1) * Bt] for h in range(num_heads)], axis=-1)
    o_ref[...] = out.astype(o_ref.dtype)                           # [Bt, N, dim]


def _pick_block_b(B_, N, dim, num_heads, itemsize):
    """Largest divisor of B_ whose per-step footprint fits a conservative VMEM
    budget, keeps >=4 grid steps when possible (v7x 2-TC sharding) and bounds
    the batched-matmul unroll."""
    # Double-buffered qkv-in + out blocks, plus in-kernel f32 temporaries
    # (attn/exp tiles and q/k/v/p/out copies), per window.
    io = 2 * (N * 3 * dim + N * dim) * itemsize
    tmp = 2 * num_heads * N * N * 4 + 6 * N * dim * 4
    per_window = io + tmp
    budget = 8 << 20            # fits the default scoped VMEM of v5e/v6e/v7x
    target = max(1, min(budget // per_window, 256))
    if B_ >= 4:
        target = max(1, min(target, B_ // 4))   # keep >=4 parallel grid steps
    divisors = [d for d in range(1, B_ + 1) if B_ % d == 0]
    fitting = [d for d in divisors if d <= target]
    return max(fitting) if fitting else 1


def window_attention(qkv, meta_w1, meta_b1, meta_w2, meta_b2, *,
                     window_size, num_heads, block_b=None):
    """qkv: [B_, N, 3*dim]; meta_* are the PyTorch nn.Linear weights:
       meta_w1 [256, 2], meta_b1 [256], meta_w2 [H, 256], meta_b2 [H]."""
    B_, N, three_dim = qkv.shape
    dim = three_dim // 3
    head_dim = dim // num_heads
    scale = float(head_dim) ** -0.5
    assert N == window_size * window_size

    if block_b is None:
        block_b = _pick_block_b(B_, N, dim, num_heads, qkv.dtype.itemsize)
    assert B_ % block_b == 0

    # ---- relative-position bias: batch-independent, computed once ----------
    NN = N * N
    hidden_dim = meta_w1.shape[0]                     # 256 in the module
    rp_t = get_relative_positions(window_size).reshape(NN, 2).T   # [2, NN]
    bias_hnn = pl.pallas_call(
        _meta_bias_kernel,
        out_shape=jax.ShapeDtypeStruct((num_heads, NN), jnp.float32),
        grid=(1,),
        in_specs=[
            pl.BlockSpec((2, NN), lambda i: (0, 0)),
            pl.BlockSpec((hidden_dim, 2), lambda i: (0, 0)),
            pl.BlockSpec((hidden_dim, 1), lambda i: (0, 0)),
            pl.BlockSpec((num_heads, hidden_dim), lambda i: (0, 0)),
            pl.BlockSpec((num_heads, 1), lambda i: (0, 0)),
        ],
        out_specs=pl.BlockSpec((num_heads, NN), lambda i: (0, 0)),
    )(
        rp_t,
        meta_w1.astype(jnp.float32),
        meta_b1.reshape(hidden_dim, 1).astype(jnp.float32),
        meta_w2.astype(jnp.float32),
        meta_b2.reshape(num_heads, 1).astype(jnp.float32),
    )
    bias = bias_hnn.reshape(num_heads, N, N)          # [H, N, N], free reshape

    # ---- main attention pass: streams qkv once, block_b windows / step -----
    kernel = functools.partial(_window_attention_kernel,
                               num_heads=num_heads, head_dim=head_dim,
                               scale=scale)
    out = pl.pallas_call(
        kernel,
        out_shape=jax.ShapeDtypeStruct((B_, N, dim), qkv.dtype),
        grid=(B_ // block_b,),
        in_specs=[
            pl.BlockSpec((block_b, N, 3 * dim), lambda b: (b, 0, 0)),
            pl.BlockSpec((num_heads, N, N), lambda b: (0, 0, 0)),  # resident
        ],
        out_specs=pl.BlockSpec((block_b, N, dim), lambda b: (b, 0, 0)),
        compiler_params=pltpu.CompilerParams(
            dimension_semantics=("parallel",)),
    )(qkv, bias)
    return out


def window_attention_ref(qkv, meta_w1, meta_b1, meta_w2, meta_b2, *,
                         window_size, num_heads):
    """Pure-JAX reference matching the PyTorch forward."""
    B_, N, three_dim = qkv.shape
    dim = three_dim // 3
    head_dim = dim // num_heads
    scale = head_dim ** -0.5
    hi = jax.lax.Precision.HIGHEST

    qkv_r = qkv.reshape(B_, N, 3, num_heads, head_dim).transpose(2, 0, 3, 1, 4)
    q, k, v = qkv_r[0], qkv_r[1], qkv_r[2]
    q = q * scale
    attn = jnp.einsum("bhqd,bhkd->bhqk", q, k, precision=hi)

    rp = get_relative_positions(window_size)                       # [N, N, 2]
    hidden = jnp.maximum(
        jnp.einsum("nmc,oc->nmo", rp, meta_w1, precision=hi) + meta_b1, 0.0)
    bias = jnp.einsum("nmo,ho->nmh", hidden, meta_w2, precision=hi) + meta_b2
    bias = jnp.transpose(bias, (2, 0, 1))                          # [H, N, N]

    attn = jax.nn.softmax(attn + bias[None], axis=-1)
    out = jnp.einsum("bhqk,bhkd->bhqd", attn, v, precision=hi)
    return out.transpose(0, 2, 1, 3).reshape(B_, N, dim)


if __name__ == "__main__":
    key = jax.random.PRNGKey(0)
    B_, dim, window_size, num_heads = 8, 32, 4, 4
    N = window_size * window_size

    k1, k2, k3, k4, k5 = jax.random.split(key, 5)
    qkv = jax.random.normal(k1, (B_, N, 3 * dim), dtype=jnp.float32)
    meta_w1 = 0.1 * jax.random.normal(k2, (256, 2), dtype=jnp.float32)
    meta_b1 = 0.1 * jax.random.normal(k3, (256,), dtype=jnp.float32)
    meta_w2 = 0.1 * jax.random.normal(k4, (num_heads, 256), dtype=jnp.float32)
    meta_b2 = 0.1 * jax.random.normal(k5, (num_heads,), dtype=jnp.float32)

    out = window_attention(qkv, meta_w1, meta_b1, meta_w2, meta_b2,
                           window_size=window_size, num_heads=num_heads)
    out = jax.block_until_ready(out)

    ref = window_attention_ref(qkv, meta_w1, meta_b1, meta_w2, meta_b2,
                               window_size=window_size, num_heads=num_heads)
    assert out.shape == (B_, N, dim)
    err = float(jnp.max(jnp.abs(out - ref)))
    # Tolerance covers MXU default precision + the EUP approximate reciprocal.
    assert jnp.allclose(out, ref, atol=2e-3, rtol=2e-3), f"mismatch, max err {err}"

    print("KERNEL_OK")
</pallas_src>

<mosaic_0001>
module attributes {stable_mosaic.version = 11 : i64} {
  func.func @_meta_bias_kernel(%arg0: i32, %arg1: memref<2x256xf32, #tpu.memory_space<vmem>>, %arg2: memref<256x2xf32, #tpu.memory_space<vmem>>, %arg3: memref<256x1xf32, #tpu.memory_space<vmem>>, %arg4: memref<4x256xf32, #tpu.memory_space<vmem>>, %arg5: memref<4x1xf32, #tpu.memory_space<vmem>>, %arg6: memref<4x256xf32, #tpu.memory_space<vmem>>) attributes {dimension_semantics = [#tpu.dimension_semantics<arbitrary>], iteration_bounds = array<i64: 1>, scalar_prefetch = 0 : i64, scratch_operands = 0 : i64, tpu.core_type = #tpu.core_type<tc>, window_params = [{pipeline_mode = #tpu.pipeline_mode<synchronous>, transform_indices = @transform_0, window_bounds = array<i64: 2, 256>}, {pipeline_mode = #tpu.pipeline_mode<synchronous>, transform_indices = @transform_1, window_bounds = array<i64: 256, 2>}, {pipeline_mode = #tpu.pipeline_mode<synchronous>, transform_indices = @transform_2, window_bounds = array<i64: 256, 1>}, {pipeline_mode = #tpu.pipeline_mode<synchronous>, transform_indices = @transform_3, window_bounds = array<i64: 4, 256>}, {pipeline_mode = #tpu.pipeline_mode<synchronous>, transform_indices = @transform_4, window_bounds = array<i64: 4, 1>}, {pipeline_mode = #tpu.pipeline_mode<synchronous>, transform_indices = @transform_5, window_bounds = array<i64: 4, 256>}]} {
    %c0 = arith.constant 0 : index
    %c0_0 = arith.constant 0 : index
    %0 = vector.load %arg1[%c0, %c0_0] : memref<2x256xf32, #tpu.memory_space<vmem>>, vector<2x256xf32>
    %c0_1 = arith.constant 0 : index
    %c0_2 = arith.constant 0 : index
    %1 = vector.load %arg2[%c0_1, %c0_2] : memref<256x2xf32, #tpu.memory_space<vmem>>, vector<256x2xf32>
    %2 = vector.extract_strided_slice %1 {offsets = [0, 0], sizes = [256, 1], strides = [1, 1]} : vector<256x2xf32> to vector<256x1xf32>
    %3 = vector.extract_strided_slice %0 {offsets = [0, 0], sizes = [1, 256], strides = [1, 1]} : vector<2x256xf32> to vector<1x256xf32>
    %4 = vector.broadcast %2 : vector<256x1xf32> to vector<256x256xf32>
    %5 = vector.broadcast %3 : vector<1x256xf32> to vector<256x256xf32>
    %6 = arith.mulf %4, %5 : vector<256x256xf32>
    %7 = vector.extract_strided_slice %1 {offsets = [0, 1], sizes = [256, 1], strides = [1, 1]} : vector<256x2xf32> to vector<256x1xf32>
    %8 = vector.extract_strided_slice %0 {offsets = [1, 0], sizes = [1, 256], strides = [1, 1]} : vector<2x256xf32> to vector<1x256xf32>
    %9 = vector.broadcast %7 : vector<256x1xf32> to vector<256x256xf32>
    %10 = vector.broadcast %8 : vector<1x256xf32> to vector<256x256xf32>
    %11 = arith.mulf %9, %10 : vector<256x256xf32>
    %12 = arith.addf %6, %11 : vector<256x256xf32>
    %c0_3 = arith.constant 0 : index
    %c0_4 = arith.constant 0 : index
    %13 = vector.load %arg3[%c0_3, %c0_4] : memref<256x1xf32, #tpu.memory_space<vmem>>, vector<256x1xf32>
    %14 = vector.broadcast %13 : vector<256x1xf32> to vector<256x256xf32>
    %15 = arith.addf %12, %14 : vector<256x256xf32>
    %cst = arith.constant 0.000000e+00 : f32
    %16 = vector.broadcast %cst : f32 to vector<256x256xf32>
    %17 = arith.maximumf %15, %16 : vector<256x256xf32>
    %c0_5 = arith.constant 0 : index
    %c0_6 = arith.constant 0 : index
    %18 = vector.load %arg4[%c0_5, %c0_6] : memref<4x256xf32, #tpu.memory_space<vmem>>, vector<4x256xf32>
    %cst_7 = arith.constant dense<0.000000e+00> : vector<4x256xf32>
    %19 = tpu.matmul %18, %17, %cst_7 {dimension_numbers = #tpu.dot_dimension_numbers<[1], [0], [0], [1], [0, 0, 1, 1], [], []>} : vector<4x256xf32>, vector<256x256xf32>, vector<4x256xf32> -> vector<4x256xf32>
    %c0_8 = arith.constant 0 : index
    %c0_9 = arith.constant 0 : index
    %20 = vector.load %arg5[%c0_8, %c0_9] : memref<4x1xf32, #tpu.memory_space<vmem>>, vector<4x1xf32>
    %21 = vector.broadcast %20 : vector<4x1xf32> to vector<4x256xf32>
    %22 = arith.addf %19, %21 : vector<4x256xf32>
    %c0_10 = arith.constant 0 : index
    %c0_11 = arith.constant 0 : index
    %23 = vector.load %arg6[%c0_10, %c0_11] : memref<4x256xf32, #tpu.memory_space<vmem>>, vector<4x256xf32>
    tpu.vector_store %arg6[%c0_10, %c0_11], %22 {strides = array<i32>} : memref<4x256xf32, #tpu.memory_space<vmem>>, vector<4x256xf32>,
    return
  }
  func.func @transform_0(%arg0: i32) -> (i32, i32) {
    %c0_i32 = arith.constant 0 : i32
    %c0_i32_0 = arith.constant 0 : i32
    %c0_i32_1 = arith.constant 0 : i32
    return %c0_i32, %c0_i32_0 : i32, i32
  }
  func.func @transform_1(%arg0: i32) -> (i32, i32) {
    %c0_i32 = arith.constant 0 : i32
    %c0_i32_0 = arith.constant 0 : i32
    %c0_i32_1 = arith.constant 0 : i32
    return %c0_i32, %c0_i32_0 : i32, i32
  }
  func.func @transform_2(%arg0: i32) -> (i32, i32) {
    %c0_i32 = arith.constant 0 : i32
    %c0_i32_0 = arith.constant 0 : i32
    %c0_i32_1 = arith.constant 0 : i32
    return %c0_i32, %c0_i32_0 : i32, i32
  }
  func.func @transform_3(%arg0: i32) -> (i32, i32) {
    %c0_i32 = arith.constant 0 : i32
    %c0_i32_0 = arith.constant 0 : i32
    %c0_i32_1 = arith.constant 0 : i32
    return %c0_i32, %c0_i32_0 : i32, i32
  }
  func.func @transform_4(%arg0: i32) -> (i32, i32) {
    %c0_i32 = arith.constant 0 : i32
    %c0_i32_0 = arith.constant 0 : i32
    %c0_i32_1 = arith.constant 0 : i32
    return %c0_i32, %c0_i32_0 : i32, i32
  }
  func.func @transform_5(%arg0: i32) -> (i32, i32) {
    %c0_i32 = arith.constant 0 : i32
    %c0_i32_0 = arith.constant 0 : i32
    %c0_i32_1 = arith.constant 0 : i32
    return %c0_i32, %c0_i32_0 : i32, i32
  }
}

</mosaic_0001>

<bundles_post_ra>
// kernel: tpu_custom_call.1
= control target key start
LH: loop header
LB: loop body
LE: loop exit
PB: predicated region body
PF: predicated region fallthrough
CT: control target
= control target key end

     0   :  { %v1745_v2 = vmov 1   ;;  %v1743_v3 = vmov 0   ;;  %s1737_s0 = inlined_call_operand.vmem [shape: f32[2,256], index: 0, kind: input, shape index: {}]   ;;  %s1738_s1 = inlined_call_operand.vmem [shape: f32[256,2], index: 1, kind: input, shape index: {}]   ;;  %s1739_s2 = inlined_call_operand.vmem [shape: f32[256,1], index: 2, kind: input, shape index: {}]   ;;  %s1740_s3 = inlined_call_operand.vmem [shape: f32[4,256], index: 3, kind: input, shape index: {}]   ;;  %s1741_s4 = inlined_call_operand.vmem [shape: f32[4,1], index: 4, kind: input, shape index: {}]   ;;  %s1742_s5 = inlined_call_operand.hbm [shape: f32[4,256], index: 5, kind: output, shape index: {}]  }
   0x1   :  { %v35_v0 = vld [vmem:[%s1738_s1 + $0x68] sm:$0xff]  ;;  %v1087_v1 = vld [vmem:[%s1738_s1 + $0x10] sm:$0xff]  ;;  %996 = vset.pattern.permute.xlu0 %v1745_v2  ;;  %994 = vset.pattern.permute.xlu1 %v1743_v3  ;;  %v1100_v5 = vld [vmem:[%s1738_s1 + $0x18] sm:$0xff] }
   0x2   :  { %350 = vperm.xlu0 %996, %v35_v0   ;;  %66 = vperm.xlu1 %994, %v1087_v1   ;;  %v1095_v4 = vld [vmem:[%s1738_s1 + $0x50] sm:$0xff]  ;;  %v29_v6 = vld [vmem:[%s1738_s1 + $0x38] sm:$0xff]  ;;  %v1110_v7 = vld [vmem:[%s1738_s1 + $0x28] sm:$0xff] }
   0x3   :  { %v26_v8 = vld [vmem:[%s1738_s1 + $0x20] sm:$0xff]  ;;  %v31_v9 = vld [vmem:[%s1738_s1 + $0x48] sm:$0xff] }
   0x4   :  { %v23_v10 = vld [vmem:[%s1738_s1 + $0x8] sm:$0xff] }
   0x6   :  { %338 = vperm.xlu0 %996, %v1095_v4   ;;  %71 = vperm.xlu1 %994, %v1100_v5  }
   0xa   :  { %326 = vperm.xlu0 %996, %v29_v6   ;;  %81 = vperm.xlu1 %994, %v1110_v7  }
   0xe   :  { %314 = vperm.xlu0 %996, %v26_v8   ;;  %91 = vperm.xlu1 %994, %v29_v6  }
   0xf   :  { %10 = vsyncpa [#allocation3], 0  ;;  %v33_v11 = vld [vmem:[%s1738_s1 + $0x58] sm:$0xff]  ;;  %v1128_v12 = vld [vmem:[%s1738_s1 + $0xf0] sm:$0xff] }
  0x10   :  { %v1134_v13 = vld [vmem:[%s1738_s1 + $0xe8] sm:$0xff]  ;;  %v1140_v14 = vld [vmem:[%s1738_s1 + $0xd0] sm:$0xff]  ;;  %v37_v15 = vld [vmem:[%s1738_s1 + $0x78] sm:$0xff] }
  0x11   :  { %v1150_v16 = vld [vmem:[%s1738_s1 + $0xc8] sm:$0xff]  ;;  %v36_v17 = vld [vmem:[%s1738_s1 + $0x70] sm:$0xff]  ;;  %v586_v19 = vld [vmem:[%s1739_s2 + $0x78] sm:$0xff] }
  0x12   :  { %101 = vperm.xlu1 %994, %v31_v9   ;;  %302 = vperm.xlu0 %996, %v23_v10   ;;  %v1159_v18 = vld [vmem:[%s1738_s1 + $0xb0] sm:$0xff]  ;;  %v1169_v20 = vld [vmem:[%s1738_s1 + $0xa8] sm:$0xff]  ;;  %v34_v21 = vld [vmem:[%s1738_s1 + $0x60] sm:$0xff] }
  0x13   :  { %v1178_v22 = vld [vmem:[%s1738_s1 + $0x90] sm:$0xff]  ;;  %v1185_v23 = vld [vmem:[%s1738_s1 + $0x88] sm:$0xff]  ;;  %v22_v25 = vld [vmem:[%s1738_s1] sm:$0xff] }
  0x14   :  { %1758 = vst [vmem:[#allocation5_spill] sm:$0xff] %v1185_v23  ;;  %v584_v24 = vld [vmem:[%s1739_s2 + $0x68] sm:$0xff]  ;;  %v583_v26 = vld [vmem:[%s1739_s2 + $0x60] sm:$0xff]  ;;  %v28_v28 = vld [vmem:[%s1738_s1 + $0x30] sm:$0xff] }
  0x15   :  { %v30_v27 = vld [vmem:[%s1738_s1 + $0x40] sm:$0xff]  ;;  %v581_v29 = vld [vmem:[%s1739_s2 + $0x50] sm:$0xff]  ;;  %v580_v30 = vld [vmem:[%s1739_s2 + $0x48] sm:$0xff] }
  0x16   :  { %111 = vperm.xlu1 %994, %v33_v11   ;;  %418 = vperm.xlu0 %996, %v1128_v12   ;;  %v578_v31 = vld [vmem:[%s1739_s2 + $0x38] sm:$0xff]  ;;  %v585_v32 = vld [vmem:[%s1739_s2 + $0x70] sm:$0xff]  ;;  %v579_v35 = vld [vmem:[%s1739_s2 + $0x40] sm:$0xff] }
  0x17   :  { %v577_v33 = vld [vmem:[%s1739_s2 + $0x30] sm:$0xff]  ;;  %v582_v34 = vld [vmem:[%s1739_s2 + $0x58] sm:$0xff]  ;;  %v576_v36 = vld [vmem:[%s1739_s2 + $0x28] sm:$0xff] }
  0x18   :  { %v573_v37 = vld [vmem:[%s1739_s2 + $0x10] sm:$0xff]  ;;  %v575_v38 = vld [vmem:[%s1739_s2 + $0x20] sm:$0xff]  ;;  %v572_v39 = vld [vmem:[%s1739_s2 + $0x8] sm:$0xff] }
  0x19   :  { %v574_v40 = vld [vmem:[%s1739_s2 + $0x18] sm:$0xff]  ;;  %v50_v41 = vld [vmem:[%s1738_s1 + $0xe0] sm:$0xff]  ;;  %v600_v44 = vld [vmem:[%s1739_s2 + $0xe8] sm:$0xff] }
  0x1a   :  { %121 = vperm.xlu1 %994, %v35_v0   ;;  %414 = vperm.xlu0 %996, %v1134_v13   ;;  %v49_v42 = vld [vmem:[%s1738_s1 + $0xd8] sm:$0xff]  ;;  %v1268_v45 = vld [vmem:[%s1738_s1 + $0xc0] sm:$0xff]  ;;  %v596_v51 = vld [vmem:[%s1739_s2 + $0xc8] sm:$0xff] }
  0x1b   :  { %v53_v43 = vld [vmem:[%s1738_s1 + $0xf8] sm:$0xff]  ;;  %v571_v54 = vld [vmem:[%s1739_s2] sm:$0xff]  ;;  %v592_v62 = vld [vmem:[%s1739_s2 + $0xa8] sm:$0xff] }
  0x1c   :  { %v1279_v48 = vld [vmem:[%s1738_s1 + $0xb8] sm:$0xff]  ;;  %v1301_v55 = vld [vmem:[%s1738_s1 + $0xa0] sm:$0xff]  ;;  %v601_v6 = vld [vmem:[%s1739_s2 + $0xf0] sm:$0xff] }
  0x1d   :  { %v1312_v58 = vld [vmem:[%s1738_s1 + $0x98] sm:$0xff] }
  0x1e   :  { %995 = vset.pattern.permute.xlu1 %v1745_v2  ;;  %402 = vperm.xlu0 %996, %v1140_v14   ;;  %v602_v61 = vld [vmem:[%s1739_s2 + $0xf8] sm:$0xff] }
  0x1f   :  { %358 = vperm.xlu1 %995, %v37_v15  }
  0x22   :  { %398 = vperm.xlu0 %996, %v1150_v16  }
  0x23   :  { %354 = vperm.xlu1 %995, %v36_v17  }
  0x26   :  { %386 = vperm.xlu0 %996, %v1159_v18  }
  0x27   :  { %997 = vset.pattern.permute.xlu1 %v1743_v3 }
  0x28   :  { %680 = vperm.xlu1 %997, %v586_v19   ;;  %v599_v19 = vld [vmem:[%s1739_s2 + $0xe0] sm:$0xff] }
  0x2a   :  { %382 = vperm.xlu0 %996, %v1169_v20  }
  0x2c   :  { %998 = vset.pattern.permute.xlu1 %v1745_v2 }
  0x2d   :  { %346 = vperm.xlu1 %998, %v34_v21  }
  0x2e   :  { %370 = vperm.xlu0 %996, %v1178_v22  }
  0x31   :  { %342 = vperm.xlu1 %998, %v33_v11  }
  0x32   :  { %366 = vperm.xlu0 %996, %v1185_v23  }
  0x35   :  { %999 = vset.pattern.permute.xlu1 %v1743_v3 }
  0x36   :  { %670 = vperm.xlu1 %999, %v584_v24   ;;  %1022 = vset.pattern.permute.xlu0 %v1743_v3 }
  0x37   :  { %56 = vperm.xlu0 %1022, %v22_v25  }
  0x3a   :  { %665 = vperm.xlu1 %999, %v583_v26  }
  0x3b   :  { %61 = vperm.xlu0 %1022, %v23_v10   ;;  %v892_v10 = vld [vmem:[%s1741_s4] sm:$0xf] }
  0x3e   :  { %1000 = vset.pattern.permute.xlu1 %v1745_v2 }
  0x3f   :  { %334 = vperm.xlu1 %1000, %v31_v9   ;;  %76 = vperm.xlu0 %1022, %v26_v8  }
  0x43   :  { %330 = vperm.xlu1 %1000, %v30_v27   ;;  %86 = vperm.xlu0 %1022, %v28_v28  }
  0x47   :  { %1001 = vset.pattern.permute.xlu1 %v1743_v3  ;;  %96 = vperm.xlu0 %1022, %v30_v27  }
  0x48   :  { %655 = vperm.xlu1 %1001, %v581_v29  }
  0x4b   :  { %106 = vperm.xlu0 %1022, %v1095_v4  }
  0x4c   :  { %650 = vperm.xlu1 %1001, %v580_v30  }
  0x4f   :  { %116 = vperm.xlu0 %1022, %v34_v21  }
  0x50   :  { %1002 = vset.pattern.permute.xlu1 %v1745_v2 }
  0x51   :  { %322 = vperm.xlu1 %1002, %v28_v28  }
  0x53   :  { %131 = vperm.xlu0 %1022, %v37_v15  }
  0x55   :  { %318 = vperm.xlu1 %1002, %v1110_v7   ;;  %v588_v7 = vld [vmem:[%s1739_s2 + $0x88] sm:$0xff] }
  0x57   :  { %126 = vperm.xlu0 %1022, %v36_v17  }
  0x59   :  { %1003 = vset.pattern.permute.xlu1 %v1743_v3 }
  0x5a   :  { %640 = vperm.xlu1 %1003, %v578_v31   ;;  %v597_v31 = vld [vmem:[%s1739_s2 + $0xd0] sm:$0xff] }
  0x5b   :  { %675 = vperm.xlu0 %1022, %v585_v32  }
  0x5e   :  { %635 = vperm.xlu1 %1003, %v577_v33  }
  0x5f   :  { %660 = vperm.xlu0 %1022, %v582_v34  }
  0x62   :  { %1004 = vset.pattern.permute.xlu1 %v1745_v2 }
  0x63   :  { %310 = vperm.xlu1 %1004, %v1100_v5   ;;  %645 = vperm.xlu0 %1022, %v579_v35  }
  0x67   :  { %306 = vperm.xlu1 %1004, %v1087_v1   ;;  %630 = vperm.xlu0 %1022, %v576_v36   ;;  %v1333_v1 = vld [vmem:[%s1738_s1 + $0x80] sm:$0xff] }
  0x68   :  { %1760 = vst [vmem:[#allocation7_spill] sm:$0xff] %v1333_v1 }
  0x6b   :  { %1005 = vset.pattern.permute.xlu1 %v1743_v3  ;;  %615 = vperm.xlu0 %1022, %v573_v37  }
  0x6c   :  { %625 = vperm.xlu1 %1005, %v575_v38  }
  0x6f   :  { %610 = vperm.xlu0 %1022, %v572_v39   ;;  %v21_v39 = vld [vmem:[%s1737_s0] sm:$0xf] }
  0x70   :  { %620 = vperm.xlu1 %1005, %v574_v40  }
  0x73   :  { %196 = vperm.xlu0 %1022, %v50_v41  }
  0x74   :  { %1006 = vset.pattern.permute.xlu1 %v1745_v2 }
  0x75   :  { %298 = vperm.xlu1 %1006, %v22_v25  }
  0x77   :  { %191 = vperm.xlu0 %1022, %v49_v42  }
  0x79   :  { %1007 = vset.pattern.permute.xlu1 %v1743_v3 }
  0x7a   :  { %211 = vperm.xlu1 %1007, %v53_v43  }
  0x7b   :  { %750 = vperm.xlu0 %1022, %v600_v44  }
  0x7d   :  { %v1270_v46 = vpop.permute.xlu1 %66  ;;  %v1272_v47 = vpop.permute.xlu0 %350 }
  0x7e   :  { %1008 = vset.pattern.permute.xlu1 %v1745_v2 }
  0x7f   :  { %176 = vperm.xlu0 %1022, %v1268_v45   ;;  %422 = vperm.xlu1 %1008, %v53_v43  }
  0x81   :  { %v1281_v49 = vpop.permute.xlu1 %71  ;;  %v1283_v50 = vpop.permute.xlu0 %338 }
  0x83   :  { %171 = vperm.xlu0 %1022, %v1279_v48   ;;  %1009 = vset.pattern.permute.xlu1 %v1743_v3 }
  0x84   :  { %206 = vperm.xlu1 %1009, %v1128_v12  }
  0x85   :  { %v1291_v52 = vpop.permute.xlu1 %81  ;;  %v1293_v53 = vpop.permute.xlu0 %326 }
  0x87   :  { %730 = vperm.xlu0 %1022, %v596_v51  }
  0x88   :  { %605 = vperm.xlu1 %1009, %v571_v54  }
  0x89   :  { %v1303_v56 = vpop.permute.xlu1 %91  ;;  %v1305_v57 = vpop.permute.xlu0 %314 }
  0x8b   :  { %156 = vperm.xlu0 %1022, %v1301_v55  }
  0x8c   :  { %201 = vperm.xlu1 %1009, %v1134_v13  }
  0x8d   :  { %v1314_v59 = vpop.permute.xlu1 %101  ;;  %v1316_v60 = vpop.permute.xlu0 %302 }
  0x8f   :  { %151 = vperm.xlu0 %1022, %v1312_v58  }
  0x90   :  { %760 = vperm.xlu1 %1009, %v602_v61  }
  0x91   :  { %v1325_v63 = vpop.permute.xlu1 %111  ;;  %v1327_v0 = vpop.permute.xlu0 %418 }
  0x92   :  { %1759 = vst [vmem:[#allocation6_spill] sm:$0xff] %v1327_v0 }
  0x93   :  { %710 = vperm.xlu0 %1022, %v592_v62  }
  0x94   :  { %1010 = vset.pattern.permute.xlu1 %v1745_v2 }
  0x95   :  { %v1335_v4 = vpop.permute.xlu1 %121  ;;  %410 = vperm.xlu1 %1010, %v50_v41   ;;  %v1337_v5 = vpop.permute.xlu0 %414 }
  0x96   :  { %1761 = vst [vmem:[#allocation8_spill] sm:$0xff] %v1337_v5 }
  0x97   :  { %136 = vperm.xlu0 %1022, %v1333_v1  }
  0x99   :  { %1011 = vset.pattern.permute.xlu1 %v1743_v3  ;;  %v1347_v8 = vpop.permute.xlu0 %402 }
  0x9a   :  { %1762 = vst [vmem:[#allocation9_spill] sm:$0xff] %v1347_v8  ;;  %v1349_v9 = vpop.permute.xlu1 %358  ;;  %755 = vperm.xlu1 %1011, %v601_v6  }
  0x9b   :  { %690 = vperm.xlu0 %1022, %v588_v7  }
  0x9d   :  { %v1354_v11 = vpop.permute.xlu0 %398 }
  0x9e   :  { %1763 = vst [vmem:[#allocation10_spill] sm:$0xff] %v1354_v11  ;;  %v1356_v12 = vpop.permute.xlu1 %354  ;;  %1012 = vset.pattern.permute.xlu1 %v1745_v2 }
  0x9f   :  { %895 = vperm.xlu0 %1022, %v892_v10   ;;  %406 = vperm.xlu1 %1012, %v49_v42  }
  0xa1   :  { %v1359_v13 = vpop.permute.xlu0 %386 }
  0xa2   :  { %1764 = vst [vmem:[#allocation11_spill] sm:$0xff] %v1359_v13 }
  0xa3   :  { %v1361_v15 = vpop.permute.xlu1 %680  ;;  %1013 = vset.pattern.permute.xlu1 %v1743_v3 }
  0xa4   :  { %186 = vperm.xlu1 %1013, %v1140_v14   ;;  %v598_v14 = vld [vmem:[%s1739_s2 + $0xd8] sm:$0xff] }
  0xa5   :  { %v1365_v17 = vpop.permute.xlu0 %382 }
  0xa6   :  { %1765 = vst [vmem:[#allocation12_spill] sm:$0xff] %v1365_v17 }
  0xa8   :  { %v1370_v21 = vpop.permute.xlu1 %346  ;;  %745 = vperm.xlu1 %1013, %v599_v19  }
  0xa9   :  { %v1372_v24 = vpop.permute.xlu0 %370 }
  0xaa   :  { %1766 = vst [vmem:[#allocation13_spill] sm:$0xff] %v1372_v24 }
  0xac   :  { %v1374_v25 = vpop.permute.xlu1 %342  ;;  %181 = vperm.xlu1 %1013, %v1150_v16   ;;  %v215_v16 = vlaneseq }
  0xad   :  { %v1377_v26 = vpop.permute.xlu0 %366 }
  0xae   :  { %1767 = vst [vmem:[#allocation14_spill] sm:$0xff] %v1377_v26  ;;  %v216_v34 = vshrl.u32 %v215_v16, 7 }
  0xb0   :  { %740 = vperm.xlu1 %1013, %v598_v14   ;;  %v217_v37 = vsub.s32 0, %v216_v34  ;;  %v221_v38 = vsub.s32 2, %v216_v34  ;;  %v427_v40 = vsub.s32 1, %v216_v34  ;;  %v431_v41 = vsub.s32 3, %v216_v34 }
  0xb1   :  { %v1382_v27 = vpop.permute.xlu1 %670 }
  0xb2   :  { %v1384_v28 = vpop.permute.xlu0 %56  ;;  %v218_v43 = vrot.slane %v21_v39, %v217_v37  ;;  %v222_v44 = vrot.slane %v21_v39, %v221_v38  ;;  %v428_v51 = vrot.slane %v21_v39, %v427_v40  ;;  %v432_v54 = vrot.slane %v21_v39, %v431_v41 }
  0xb3   :  { %1768 = vst [vmem:[#allocation15_spill] sm:$0xff] %v1384_v28 }
  0xb4   :  { %1014 = vset.pattern.permute.xlu1 %v1745_v2  ;;  %v1420_v62 = vrot.slane %v218_v43, %v217_v37  ;;  %v1422_v6 = vrot.slane %v222_v44, %v217_v37  ;;  %v1426_v10 = vrot.slane %v428_v51, %v427_v40  ;;  %v1428_v19 = vrot.slane %v432_v54, %v427_v40  ;;  %v594_v44 = vld [vmem:[%s1739_s2 + $0xb8] sm:$0xff] }
  0xb5   :  { %v1387_v29 = vpop.permute.xlu1 %665  ;;  %394 = vperm.xlu1 %1014, %v1268_v45  }
  0xb6   :  { %v1390_v30 = vpop.permute.xlu0 %61  ;;  %v1436_v16 = vmul.f32 %v1422_v6, %v1270_v46  ;;  %v470_v34 = vmul.f32 %v1428_v19, %v1272_v47  ;;  %v1444_v37 = vmul.f32 %v1420_v62, %v1281_v49  ;;  %v1448_v38 = vmul.f32 %v1422_v6, %v1281_v49 }
  0xb7   :  { %v457_v39 = vmul.f32 %v1426_v10, %v1293_v53  ;;  %v1463_v41 = vmul.f32 %v1428_v19, %v1283_v50  ;;  %v1467_v49 = vmul.f32 %v1420_v62, %v1291_v52  ;;  %v259_v43 = vmul.f32 %v1420_v62, %v1335_v4 }
  0xb8   :  { %1770 = vst [vmem:[#allocation17_spill] sm:$0xff] %v1444_v37  ;;  %v1480_v51 = vmul.f32 %v1428_v19, %v1293_v53  ;;  %v1488_v54 = vmul.f32 %v1426_v10, %v1305_v57  ;;  %v1498_v24 = vmul.f32 %v1428_v19, %v1305_v57  ;;  %v260_v26 = vmul.f32 %v1422_v6, %v1335_v4 }
  0xb9   :  { %1015 = vset.pattern.permute.xlu1 %v1743_v3  ;;  %v471_v57 = vmul.f32 %v1426_v10, %v1356_v12  ;;  %v472_v0 = vmul.f32 %v1428_v19, %v1356_v12  ;;  %v465_v12 = vmul.f32 %v1426_v10, %v1374_v25 }
  0xba   :  { %v1396_v32 = vpop.permute.xlu1 %334  ;;  %v1398_v33 = vpop.permute.xlu0 %76  ;;  %735 = vperm.xlu1 %1015, %v597_v31   ;;  %v469_v31 = vmul.f32 %v1426_v10, %v1272_v47  ;;  %v1459_v47 = vmul.f32 %v1426_v10, %v1283_v50  ;;  %v1484_v50 = vmul.f32 %v1422_v6, %v1303_v56 }
  0xbe   :  { %v1400_v35 = vpop.permute.xlu1 %330  ;;  %v1402_v36 = vpop.permute.xlu0 %86  ;;  %1016 = vset.pattern.permute.xlu1 %v1745_v2 }
  0xbf   :  { %390 = vperm.xlu1 %1016, %v1279_v48   ;;  %v595_v48 = vld [vmem:[%s1739_s2 + $0xc0] sm:$0xff] }
  0xc2   :  { %v1409_v42 = vpop.permute.xlu0 %96 }
  0xc3   :  { %v1411_v45 = vpop.permute.xlu1 %655  ;;  %1017 = vset.pattern.permute.xlu1 %v1743_v3  ;;  %v473_v3 = vmul.f32 %v1426_v10, %v1349_v9 }
  0xc4   :  { %166 = vperm.xlu1 %1017, %v1159_v18   ;;  %v1432_v18 = vmul.f32 %v1420_v62, %v1270_v46  ;;  %v247_v46 = vmul.f32 %v1420_v62, %v1303_v56  ;;  %v1502_v56 = vmul.f32 %v1420_v62, %v1314_v59 }
  0xc6   :  { %v1418_v61 = vpop.permute.xlu0 %106  ;;  %1769 = vst [vmem:[#allocation16_spill] sm:$0xff] %v1432_v18  ;;  %v1508_v17 = vadd.f32 %v457_v39, %v247_v46 }
  0xc7   :  { %v1424_v7 = vpop.permute.xlu1 %650 }
  0xc8   :  { %725 = vperm.xlu1 %1017, %v595_v48  }
  0xca   :  { %v117_v14 = vpop.permute.xlu0 %116 }
  0xcb   :  { %v257_v5 = vmul.f32 %v1420_v62, %v117_v14  ;;  %v258_v4 = vmul.f32 %v1422_v6, %v117_v14  ;;  %v1771_v14 = vmov 1  }
  0xcc   :  { %v1454_v40 = vpop.permute.xlu1 %322  ;;  %161 = vperm.xlu1 %1017, %v1169_v20   ;;  %v1476_v20 = vmul.f32 %v1422_v6, %v1291_v52  ;;  %v474_v52 = vmul.f32 %v1428_v19, %v1349_v9  ;;  %v255_v9 = vmul.f32 %v1420_v62, %v1325_v63 }
  0xce   :  { %v132_v48 = vpop.permute.xlu0 %131 }
  0xcf   :  { %v263_v2 = vmul.f32 %v1420_v62, %v132_v48  ;;  %v264_v53 = vmul.f32 %v1422_v6, %v132_v48  ;;  %v533_v48 = vadd.f32 %v469_v31, %v259_v43  ;;  %v468_v31 = vmul.f32 %v1428_v19, %v1370_v21 }
  0xd0   :  { %v1506_v13 = vpop.permute.xlu1 %318  ;;  %720 = vperm.xlu1 %1017, %v594_v44   ;;  %v534_v43 = vadd.f32 %v470_v34, %v260_v26  ;;  %v253_v34 = vmul.f32 %v1420_v62, %v1418_v61 }
  0xd1   :  { %v537_v8 = vadd.f32 %v473_v3, %v263_v2  ;;  %v538_v11 = vadd.f32 %v474_v52, %v264_v53  ;;  %v467_v3 = vmul.f32 %v1426_v10, %v1370_v21  ;;  %v254_v21 = vmul.f32 %v1422_v6, %v1418_v61 }
  0xd2   :  { %v127_v28 = vpop.permute.xlu0 %126  ;;  %v790_v1 = vadd.f32 %v1382_v27, %v534_v43  ;;  %v532_v23 = vadd.f32 %v468_v31, %v258_v4  ;;  %v789_v4 = vadd.f32 %v1382_v27, %v533_v48  ;;  %v249_v48 = vmul.f32 %v1420_v62, %v1409_v42 }
  0xd3   :  { %v261_v39 = vmul.f32 %v1420_v62, %v127_v28  ;;  %v262_v46 = vmul.f32 %v1422_v6, %v127_v28  ;;  %v794_v44 = vadd.f32 %v1361_v15, %v538_v11  ;;  %v793_v2 = vadd.f32 %v1361_v15, %v537_v8 }
  0xd4   :  { %1018 = vset.pattern.permute.xlu1 %v1771_v14  ;;  %v466_v15 = vmul.f32 %v1428_v19, %v1374_v25  ;;  %v531_v37 = vadd.f32 %v467_v3, %v257_v5  ;;  %v252_v25 = vmul.f32 %v1422_v6, %v1314_v59  ;;  %v462_v5 = vmul.f32 %v1428_v19, %v1396_v32 }
  0xd5   :  { %v1529_v52 = vpop.permute.xlu1 %640  ;;  %378 = vperm.xlu1 %1018, %v1301_v55   ;;  %v535_v28 = vadd.f32 %v471_v57, %v261_v39  ;;  %v536_v11 = vadd.f32 %v472_v0, %v262_v46  ;;  %v858_v53 = vmax.f32 %v794_v44, 0.0  ;;  %v857_v8 = vmax.f32 %v793_v2, 0.0  ;;  %v593_v0 = vld [vmem:[%s1739_s2 + $0xb0] sm:$0xff] }
  0xd6   :  { %v676_v26 = vpop.permute.xlu0 %675  ;;  %v256_v57 = vmul.f32 %v1422_v6, %v1325_v63  ;;  %v461_v39 = vmul.f32 %v1426_v10, %v1396_v32  ;;  %v1772_v2 = vmov 0   ;;  %v529_v3 = vadd.f32 %v465_v12, %v255_v9 }
  0xd7   :  { %v791_v18 = vadd.f32 %v676_v26, %v535_v28  ;;  %v792_v55 = vadd.f32 %v676_v26, %v536_v11  ;;  %901 = vmatprep.subr.mxu0 %v858_v53  ;;  %v854_v59 = vmax.f32 %v790_v1, 0.0  ;;  %v528_v31 = vadd.f32 %v1463_v41, %v254_v21 }
  0xd8   :  { %902 = vmatpush1.msra.mxu0 %v857_v8  ;;  %v530_v43 = vadd.f32 %v466_v15, %v256_v57  ;;  %v788_v27 = vadd.f32 %v1387_v29, %v532_v23  ;;  %v250_v32 = vmul.f32 %v1422_v6, %v1409_v42  ;;  %v787_v28 = vadd.f32 %v1387_v29, %v531_v37 }
  0xd9   :  { %v855_v61 = vmax.f32 %v791_v18, 0.0  ;;  %v856_v46 = vmax.f32 %v792_v55, 0.0  ;;  %v1551_v44 = vpop.permute.xlu1 %635  ;;  %1019 = vset.pattern.permute.xlu1 %v1772_v2  ;;  %v527_v18 = vadd.f32 %v1459_v47, %v253_v34  ;;  %v853_v9 = vmax.f32 %v789_v4, 0.0 }
  0xda   :  { %v661_v63 = vpop.permute.xlu0 %660  ;;  %715 = vperm.xlu1 %1019, %v593_v0   ;;  %v525_v1 = vadd.f32 %v461_v39, %v1502_v56  ;;  %v522_v41 = vadd.f32 %v1480_v51, %v1484_v50  ;;  %v459_v23 = vmul.f32 %v1426_v10, %v1400_v35  ;;  %v460_v11 = vmul.f32 %v1428_v19, %v1400_v35 }
  0xdb   :  { %903 = vmatprep.subr.mxu0 %v856_v46  ;;  %v786_v12 = vadd.f32 %v661_v63, %v530_v43  ;;  %v526_v42 = vadd.f32 %v462_v5, %v252_v25  ;;  %v785_v53 = vadd.f32 %v661_v63, %v529_v3  ;;  %v245_v29 = vmul.f32 %v1420_v62, %v1402_v36 }
  0xdc   :  { %904 = vmatpush1.msra.mxu0 %v855_v61  ;;  %v246_v37 = vmul.f32 %v1422_v6, %v1402_v36  ;;  %v852_v51 = vmax.f32 %v788_v27, 0.0  ;;  %v784_v50 = vadd.f32 %v1411_v45, %v528_v31  ;;  %v523_v8 = vadd.f32 %v459_v23, %v249_v48 }
  0xdd   :  { %905 = vmatprep.subr.mxu0 %v854_v59  ;;  %v524_v15 = vadd.f32 %v460_v11, %v250_v32  ;;  %v851_v35 = vmax.f32 %v787_v28, 0.0  ;;  %v783_v21 = vadd.f32 %v1411_v45, %v527_v18  ;;  %v782_v26 = vadd.f32 %v1424_v7, %v526_v42 }
  0xde   :  { %v311_v47 = vpop.permute.xlu1 %310  ;;  %v646_v56 = vpop.permute.xlu0 %645  ;;  %1020 = vset.pattern.permute.xlu1 %v1771_v14  ;;  %906 = vmatpush1.msra.mxu0 %v853_v9  ;;  %v455_v36 = vmul.f32 %v1426_v10, %v1454_v40  ;;  %v456_v34 = vmul.f32 %v1428_v19, %v1454_v40  ;;  %v850_v55 = vmax.f32 %v786_v12, 0.0  ;;  %v781_v0 = vadd.f32 %v1424_v7, %v525_v1  ;;  %v591_v1 = vld [vmem:[%s1739_s2 + $0xa0] sm:$0xff] }
  0xdf   :  { %374 = vperm.xlu1 %1020, %v1312_v58   ;;  %907 = vmatprep.subr.mxu0 %v852_v51  ;;  %v453_v25 = vmul.f32 %v1426_v10, %v1506_v13  ;;  %v454_v58 = vmul.f32 %v1428_v19, %v1506_v13  ;;  %v849_v57 = vmax.f32 %v785_v53, 0.0  ;;  %v1589_v45 = vmul.f32 %v1426_v10, %v1316_v60 }
  0xe0   :  { %908 = vmatpush1.msra.mxu0 %v851_v35  ;;  %v1593_v4 = vmul.f32 %v1428_v19, %v1316_v60  ;;  %v780_v40 = vadd.f32 %v646_v56, %v524_v15  ;;  %v848_v5 = vmax.f32 %v784_v50, 0.0  ;;  %v241_v61 = vmul.f32 %v1420_v62, %v1398_v33  ;;  %v1773_v15 = vld [vmem:[#allocation16_spill] sm:$0xff] }
  0xe1   :  { %909 = vmatprep.subr.mxu0 %v850_v55  ;;  %v242_v13 = vmul.f32 %v1422_v6, %v1398_v33  ;;  %v779_v46 = vadd.f32 %v646_v56, %v523_v8  ;;  %v847_v3 = vmax.f32 %v783_v21, 0.0  ;;  %v846_v59 = vmax.f32 %v782_v26, 0.0 }
  0xe2   :  { %v307_v39 = vpop.permute.xlu1 %306  ;;  %v631_v7 = vpop.permute.xlu0 %630  ;;  %910 = vmatpush1.msra.mxu0 %v849_v57  ;;  %v778_v31 = vadd.f32 %v1529_v52, %v522_v41  ;;  %v519_v63 = vadd.f32 %v455_v36, %v245_v29  ;;  %v520_v60 = vadd.f32 %v456_v34, %v246_v37  ;;  %v845_v43 = vmax.f32 %v781_v0, 0.0 }
  0xe3   :  { %1021 = vset.pattern.permute.xlu1 %v1772_v2  ;;  %911 = vmatprep.subr.mxu0 %v848_v5  ;;  %v777_v27 = vadd.f32 %v1529_v52, %v1508_v17  ;;  %v517_v48 = vadd.f32 %v453_v25, %v1467_v49  ;;  %v518_v32 = vadd.f32 %v454_v58, %v1476_v20  ;;  %v844_v28 = vmax.f32 %v780_v40, 0.0  ;;  %v1775_v25 = vld [vmem:[#allocation5_spill] sm:$0xff]  ;;  %v590_v40 = vld [vmem:[%s1739_s2 + $0x98] sm:$0xff] }
  0xe4   :  { %146 = vperm.xlu1 %1021, %v1178_v22   ;;  %912 = vmatpush1.msra.mxu0 %v847_v3  ;;  %v776_v33 = vadd.f32 %v1551_v44, %v520_v60  ;;  %v450_v18 = vmul.f32 %v1428_v19, %v311_v47  ;;  %v448_v9 = vmul.f32 %v1428_v19, %v307_v39  ;;  %v843_v20 = vmax.f32 %v779_v46, 0.0 }
  0xe5   :  { %913 = vmatprep.subr.mxu0 %v846_v59  ;;  %v775_v17 = vadd.f32 %v1551_v44, %v519_v63  ;;  %v449_v49 = vmul.f32 %v1426_v10, %v311_v47  ;;  %v447_v22 = vmul.f32 %v1426_v10, %v307_v39  ;;  %v235_v12 = vmul.f32 %v1420_v62, %v1390_v30 }
  0xe6   :  { %v616_v52 = vpop.permute.xlu0 %615  ;;  %914 = vmatpush1.msra.mxu0 %v845_v43  ;;  %v842_v23 = vmax.f32 %v778_v31, 0.0  ;;  %v774_v11 = vadd.f32 %v631_v7, %v518_v32  ;;  %v516_v42 = vadd.f32 %v1498_v24, %v242_v13  ;;  %v236_v53 = vmul.f32 %v1422_v6, %v1390_v30  ;;  %v1774_v30 = vld [vmem:[#allocation17_spill] sm:$0xff]  ;;  %v589_v43 = vld [vmem:[%s1739_s2 + $0x90] sm:$0xff]  ;;  %v1777_v32 = vld [vmem:[#allocation15_spill] sm:$0xff] }
  0xe7   :  { %v626_v41 = vpop.permute.xlu1 %625  ;;  %915 = vmatprep.subr.mxu0 %v844_v28  ;;  %v841_v44 = vmax.f32 %v777_v27, 0.0  ;;  %v773_v29 = vadd.f32 %v631_v7, %v517_v48  ;;  %v515_v37 = vadd.f32 %v1488_v54, %v241_v61  ;;  %v840_v47 = vmax.f32 %v776_v33, 0.0  ;;  %v587_v48 = vld [vmem:[%s1739_s2 + $0x80] sm:$0xff]  ;;  %s1050_s2 = smov [#allocation2]  }
  0xe8   :  { %705 = vperm.xlu1 %1021, %v591_v1   ;;  %916 = vmatpush1.msra.mxu0 %v843_v20  ;;  %v512_v56 = vadd.f32 %v448_v9, %v1436_v16  ;;  %v772_v51 = vadd.f32 %v626_v41, %v516_v42  ;;  %v514_v50 = vadd.f32 %v450_v18, %v1448_v38  ;;  %v839_v8 = vmax.f32 %v775_v17, 0.0  ;;  %v1645_v33 = vld [vmem:[%s1740_s3] sm:$0xff]  ;;  %s983_s3 = sshll.u32 %s1050_s2, 4  ;;  %s984_s3 = int_to_ptr.vmem [resolvable:$true] %s983_s3 }
  0xe9   :  { %917 = vmatprep.subr.mxu0 %v842_v23  ;;  %v511_v24 = vadd.f32 %v447_v22, %v1773_v15  ;;  %v771_v35 = vadd.f32 %v626_v41, %v515_v37  ;;  %v513_v26 = vadd.f32 %v449_v49, %v1774_v30  ;;  %v838_v36 = vmax.f32 %v774_v11, 0.0  ;;  %v1778_v30 = vld [vmem:[#allocation8_spill] sm:$0xff]  ;;  %s1026_s24 = scalar_lea.vmem %s984_s3, 128  ;;  %p1031_p1 = scmp.lt.s32.totalorder %s984_s3, %s984_s3 }
  0xea   :  { %918 = vmatpush1.msra.mxu0 %v841_v44  ;;  %v837_v54 = vmax.f32 %v773_v29, 0.0  ;;  %v611_v55 = vpop.permute.xlu0 %610  ;;  %v768_v16 = vadd.f32 %v616_v52, %v512_v56  ;;  %v836_v58 = vmax.f32 %v772_v51, 0.0  ;;  %v510_v38 = vadd.f32 %v1593_v4, %v236_v53  ;;  %p1027_p0 = scmp.ne.s32.totalorder %s984_s3, %s1026_s24  ;;  %p1032_p2 = scmp.lt.s32.totalorder %s1026_s24, %s1026_s24 }
  0xeb   :  { %v621_v21 = vpop.permute.xlu1 %620  ;;  %919 = vmatprep.subr.mxu0 %v840_v47  ;;  %v767_v39 = vadd.f32 %v616_v52, %v511_v24  ;;  %v835_v7 = vmax.f32 %v771_v35, 0.0  ;;  %v509_v5 = vadd.f32 %v1589_v45, %v235_v12  ;;  %v1776_v45 = vld [vmem:[#allocation7_spill] sm:$0xff]  ;;  %v234_v18 = vmul.f32 %v1422_v6, %v1777_v32 }
  0xec   :  { %v770_v34 = vadd.f32 %v621_v21, %v514_v50  ;;  %v769_v0 = vadd.f32 %v621_v21, %v513_v26  ;;  %141 = vperm.xlu1 %1021, %v1775_v25   ;;  %920 = vmatpush1.msra.mxu0 %v839_v8  ;;  %v766_v61 = vadd.f32 %v611_v55, %v510_v38  ;;  %v832_v59 = vmax.f32 %v768_v16, 0.0  ;;  %p1033_p3 = por %p1032_p2, %p1031_p1 }
  0xed   :  { %921 = vmatprep.subr.mxu0 %v838_v36  ;;  %v765_v46 = vadd.f32 %v611_v55, %v509_v5  ;;  %v831_v4 = vmax.f32 %v767_v39, 0.0  ;;  %v899_v9 = vcombine.high %v1645_v33, %v1645_v33  ;;  %v502_v26 = vmul.f32 %v1428_v19, %v1778_v30 }
  0xee   :  { %v834_v57 = vmax.f32 %v770_v34, 0.0  ;;  %922 = vmatpush1.msra.mxu0 %v837_v54  ;;  %v833_v3 = vmax.f32 %v769_v0, 0.0  ;;  %v830_v31 = vmax.f32 %v766_v61, 0.0  ;;  %v197_v29 = vpop.permute.xlu0 %196  ;;  %v501_v55 = vmul.f32 %v1426_v10, %v1778_v30  ;;  %v1779_v0 = vld [vmem:[#allocation6_spill] sm:$0xff]  ;;  %p1034_p4 = pnand %p1033_p3, %p1027_p0 }
  0xef   :  { %923 = vmatprep.subr.mxu0 %v836_v58  ;;  %v829_v63 = vmax.f32 %v765_v46, 0.0  ;;  %965 = vmatprep.mubr.f32.mxu0 %v899_v9  ;;  %v503_v25 = vmul.f32 %v1426_v10, %v1779_v0  ;;  %v504_v16 = vmul.f32 %v1428_v19, %v1779_v0 }
  0xf0   :  { %v299_v13 = vpop.permute.xlu1 %298  ;;  %700 = vperm.xlu1 %1021, %v590_v40   ;;  %924 = vmatpush1.msra.mxu0 %v835_v7 }
  0xf1   :  { %925 = vmatprep.subr.mxu0 %v834_v57  ;;  %v443_v28 = vmul.f32 %v1426_v10, %v299_v13 }
  0xf2   :  { %926 = vmatpush1.msra.mxu0 %v833_v3  ;;  %v192_v35 = vpop.permute.xlu0 %191 }
  0xf3   :  { %927 = vmatprep.subr.mxu0 %v832_v59 }
  0xf4   :  { %1023 = vset.pattern.permute.xlu1 %v1771_v14  ;;  %928 = vmatpush1.msra.mxu0 %v831_v4  ;;  %v233_v14 = vmul.f32 %v1420_v62, %v1777_v32 }
  0xf5   :  { %v212_v60 = vpop.permute.xlu1 %211  ;;  %362 = vperm.xlu1 %1023, %v1776_v45   ;;  %929 = vmatprep.subr.mxu0 %v830_v31  ;;  %v290_v45 = vmul.f32 %v1422_v6, %v197_v29 }
  0xf6   :  { %930 = vmatpush1.msra.mxu0 %v829_v63  ;;  %v507_v17 = vadd.f32 %v443_v28, %v233_v14  ;;  %v295_v53 = vmul.f32 %v1420_v62, %v212_v60  ;;  %v296_v44 = vmul.f32 %v1422_v6, %v212_v60  ;;  %v751_v39 = vpop.permute.xlu0 %750  ;;  %v289_v60 = vmul.f32 %v1420_v62, %v197_v29 }
  0xf9   :  { %1024 = vset.pattern.permute.xlu1 %v1772_v2  ;;  %v444_v2 = vmul.f32 %v1428_v19, %v299_v13 }
  0xfa   :  { %v423_v27 = vpop.permute.xlu1 %422  ;;  %695 = vperm.xlu1 %1024, %v589_v43  }
  0xfb   :  { %v508_v49 = vadd.f32 %v444_v2, %v234_v18  ;;  %v505_v41 = vmul.f32 %v1426_v10, %v423_v27  ;;  %v506_v12 = vmul.f32 %v1428_v19, %v423_v27 }
  0xfd   :  { %v569_v37 = vadd.f32 %v505_v41, %v295_v53  ;;  %v570_v47 = vadd.f32 %v506_v12, %v296_v44  ;;  %v177_v41 = vpop.permute.xlu0 %176 }
  0xfe   :  { %685 = vperm.xlu1 %1024, %v587_v48  }
  0xff   :  { %v207_v1 = vpop.permute.xlu1 %206 }
 0x100   :  { %v293_v36 = vmul.f32 %v1420_v62, %v207_v1  ;;  %v294_v34 = vmul.f32 %v1422_v6, %v207_v1 }
 0x102   :  { %v567_v57 = vadd.f32 %v503_v25, %v293_v36  ;;  %v568_v40 = vadd.f32 %v504_v16, %v294_v34 }
 0x103   :  { %v606_v20 = vpop.permute.xlu1 %605 }
 0x104   :  { %v763_v22 = vadd.f32 %v606_v20, %v507_v17  ;;  %v764_v52 = vadd.f32 %v606_v20, %v508_v49 }
 0x106   :  { %v827_v23 = vmax.f32 %v763_v22, 0.0  ;;  %v828_v11 = vmax.f32 %v764_v52, 0.0  ;;  %v287_v22 = vmul.f32 %v1420_v62, %v192_v35  ;;  %v288_v52 = vmul.f32 %v1422_v6, %v192_v35 }
 0x107   :  { %v202_v42 = vpop.permute.xlu1 %201 }
 0x108   :  { %931 = vmatprep.subr.mxu0 %v828_v11  ;;  %v292_v8 = vmul.f32 %v1422_v6, %v202_v42  ;;  %v291_v21 = vmul.f32 %v1420_v62, %v202_v42 }
 0x109   :  { %932 = vmatpush1.msra.mxu0 %v827_v23 }
 0x10a   :  { %v566_v58 = vadd.f32 %v502_v26, %v292_v8  ;;  %v565_v38 = vadd.f32 %v501_v55, %v291_v21  ;;  %v1781_v21 = vld [vmem:[#allocation9_spill] sm:$0xff] }
 0x10b   :  { %v761_v56 = vpop.permute.xlu1 %760  ;;  %v495_v30 = vmul.f32 %v1426_v10, %v1781_v21  ;;  %v496_v26 = vmul.f32 %v1428_v19, %v1781_v21 }
 0x10c   :  { %v825_v51 = vadd.f32 %v761_v56, %v569_v37  ;;  %v826_v50 = vadd.f32 %v761_v56, %v570_v47  ;;  %v822_v13 = vadd.f32 %v751_v39, %v566_v58  ;;  %v821_v46 = vadd.f32 %v751_v39, %v565_v38  ;;  %v172_v47 = vpop.permute.xlu0 %171 }
 0x10e   :  { %v889_v15 = vmax.f32 %v825_v51, 0.0  ;;  %v890_v24 = vmax.f32 %v826_v50, 0.0  ;;  %v886_v31 = vmax.f32 %v822_v13, 0.0  ;;  %v885_v63 = vmax.f32 %v821_v46, 0.0  ;;  %v1780_v51 = vld [vmem:[#allocation10_spill] sm:$0xff] }
 0x10f   :  { %v494_v50 = vmul.f32 %v1428_v19, %v1780_v51  ;;  %v493_v35 = vmul.f32 %v1426_v10, %v1780_v51 }
 0x110   :  { %v411_v54 = vpop.permute.xlu1 %410  ;;  %933 = vmatprep.subr.mxu0 %v890_v24  ;;  %v731_v0 = vpop.permute.xlu0 %730 }
 0x111   :  { %934 = vmatpush2.msra.mxu0 %v889_v15  ;;  %v499_v43 = vmul.f32 %v1426_v10, %v411_v54  ;;  %v500_v27 = vmul.f32 %v1428_v19, %v411_v54 }
 0x113   :  { %v563_v32 = vadd.f32 %v499_v43, %v289_v60  ;;  %v564_v14 = vadd.f32 %v500_v27, %v290_v45 }
 0x115   :  { %v756_v7 = vpop.permute.xlu1 %755 }
 0x116   :  { %v823_v5 = vadd.f32 %v756_v7, %v567_v57  ;;  %v824_v61 = vadd.f32 %v756_v7, %v568_v40 }
 0x118   :  { %v887_v3 = vmax.f32 %v823_v5, 0.0  ;;  %v888_v59 = vmax.f32 %v824_v61, 0.0 }
 0x11a   :  { %v407_v4 = vpop.permute.xlu1 %406  ;;  %935 = vmatprep.subr.mxu0 %v888_v59  ;;  %v281_v59 = vmul.f32 %v1420_v62, %v177_v41 }
 0x11b   :  { %936 = vmatpush2.msra.mxu0 %v887_v3  ;;  %v497_v9 = vmul.f32 %v1426_v10, %v407_v4  ;;  %v498_v1 = vmul.f32 %v1428_v19, %v407_v4  ;;  %v282_v4 = vmul.f32 %v1422_v6, %v177_v41 }
 0x11c   :  { %937 = vmatprep.subr.mxu0 %v886_v31 }
 0x11d   :  { %938 = vmatpush2.msra.mxu0 %v885_v63  ;;  %v561_v12 = vadd.f32 %v497_v9, %v287_v22  ;;  %v562_v23 = vadd.f32 %v498_v1, %v288_v52  ;;  %v157_v9 = vpop.permute.xlu0 %156 }
 0x11f   :  { %v187_v48 = vpop.permute.xlu1 %186 }
 0x120   :  { %v285_v8 = vmul.f32 %v1420_v62, %v187_v48  ;;  %v286_v15 = vmul.f32 %v1422_v6, %v187_v48 }
 0x122   :  { %v559_v54 = vadd.f32 %v495_v30, %v285_v8  ;;  %v560_v55 = vadd.f32 %v496_v26, %v286_v15 }
 0x123   :  { %v746_v18 = vpop.permute.xlu1 %745 }
 0x124   :  { %v819_v28 = vadd.f32 %v746_v18, %v563_v32  ;;  %v820_v2 = vadd.f32 %v746_v18, %v564_v14 }
 0x126   :  { %v883_v17 = vmax.f32 %v819_v28, 0.0  ;;  %v884_v49 = vmax.f32 %v820_v2, 0.0  ;;  %v279_v28 = vmul.f32 %v1420_v62, %v172_v47  ;;  %v280_v2 = vmul.f32 %v1422_v6, %v172_v47 }
 0x127   :  { %v182_v20 = vpop.permute.xlu1 %181 }
 0x128   :  { %939 = vmatprep.subr.mxu0 %v884_v49  ;;  %v284_v44 = vmul.f32 %v1422_v6, %v182_v20  ;;  %v283_v56 = vmul.f32 %v1420_v62, %v182_v20 }
 0x129   :  { %940 = vmatpush2.msra.mxu0 %v883_v17 }
 0x12a   :  { %v558_v36 = vadd.f32 %v494_v50, %v284_v44  ;;  %v557_v34 = vadd.f32 %v493_v35, %v283_v56  ;;  %v1783_v56 = vld [vmem:[#allocation11_spill] sm:$0xff] }
 0x12b   :  { %v741_v11 = vpop.permute.xlu1 %740  ;;  %v487_v51 = vmul.f32 %v1426_v10, %v1783_v56  ;;  %v488_v50 = vmul.f32 %v1428_v19, %v1783_v56 }
 0x12c   :  { %v817_v42 = vadd.f32 %v741_v11, %v561_v12  ;;  %v818_v53 = vadd.f32 %v741_v11, %v562_v23  ;;  %v814_v38 = vadd.f32 %v731_v0, %v558_v36  ;;  %v813_v57 = vadd.f32 %v731_v0, %v557_v34  ;;  %v152_v23 = vpop.permute.xlu0 %151 }
 0x12e   :  { %v881_v29 = vmax.f32 %v817_v42, 0.0  ;;  %v882_v37 = vmax.f32 %v818_v53, 0.0  ;;  %v878_v5 = vmax.f32 %v814_v38, 0.0  ;;  %v877_v61 = vmax.f32 %v813_v57, 0.0  ;;  %v1782_v42 = vld [vmem:[#allocation12_spill] sm:$0xff] }
 0x12f   :  { %v486_v53 = vmul.f32 %v1428_v19, %v1782_v42  ;;  %v485_v47 = vmul.f32 %v1426_v10, %v1782_v42 }
 0x130   :  { %v395_v24 = vpop.permute.xlu1 %394  ;;  %941 = vmatprep.subr.mxu0 %v882_v37  ;;  %v711_v21 = vpop.permute.xlu0 %710 }
 0x131   :  { %942 = vmatpush2.msra.mxu0 %v881_v29  ;;  %v491_v13 = vmul.f32 %v1426_v10, %v395_v24  ;;  %v492_v46 = vmul.f32 %v1428_v19, %v395_v24 }
 0x133   :  { %v555_v31 = vadd.f32 %v491_v13, %v281_v59  ;;  %v556_v63 = vadd.f32 %v492_v46, %v282_v4 }
 0x135   :  { %v736_v25 = vpop.permute.xlu1 %735 }
 0x136   :  { %v815_v16 = vadd.f32 %v736_v25, %v559_v54  ;;  %v816_v58 = vadd.f32 %v736_v25, %v560_v55 }
 0x138   :  { %v879_v40 = vmax.f32 %v815_v16, 0.0  ;;  %v880_v39 = vmax.f32 %v816_v58, 0.0 }
 0x13a   :  { %v391_v7 = vpop.permute.xlu1 %390  ;;  %943 = vmatprep.subr.mxu0 %v880_v39  ;;  %v273_v39 = vmul.f32 %v1420_v62, %v157_v9 }
 0x13b   :  { %944 = vmatpush2.msra.mxu0 %v879_v40  ;;  %v489_v27 = vmul.f32 %v1426_v10, %v391_v7  ;;  %v490_v48 = vmul.f32 %v1428_v19, %v391_v7  ;;  %v274_v7 = vmul.f32 %v1422_v6, %v157_v9 }
 0x13c   :  { %945 = vmatprep.subr.mxu0 %v878_v5 }
 0x13d   :  { %946 = vmatpush2.msra.mxu0 %v877_v61  ;;  %v553_v1 = vadd.f32 %v489_v27, %v279_v28  ;;  %v554_v17 = vadd.f32 %v490_v48, %v280_v2 }
 0x13f   :  { %v167_v3 = vpop.permute.xlu1 %166 }
 0x140   :  { %v277_v44 = vmul.f32 %v1420_v62, %v167_v3  ;;  %v278_v29 = vmul.f32 %v1422_v6, %v167_v3 }
 0x142   :  { %v551_v24 = vadd.f32 %v487_v51, %v277_v44  ;;  %v552_v35 = vadd.f32 %v488_v50, %v278_v29 }
 0x143   :  { %v726_v60 = vpop.permute.xlu1 %725 }
 0x144   :  { %v811_v45 = vadd.f32 %v726_v60, %v555_v31  ;;  %v812_v43 = vadd.f32 %v726_v60, %v556_v63 }
 0x146   :  { %v875_v32 = vmax.f32 %v811_v45, 0.0  ;;  %v876_v14 = vmax.f32 %v812_v43, 0.0  ;;  %v271_v45 = vmul.f32 %v1420_v62, %v152_v23  ;;  %v272_v43 = vmul.f32 %v1422_v6, %v152_v23  ;;  %v1785_v23 = vld [vmem:[#allocation13_spill] sm:$0xff] }
 0x147   :  { %v162_v18 = vpop.permute.xlu1 %161  ;;  %v480_v42 = vmul.f32 %v1428_v19, %v1785_v23 }
 0x148   :  { %947 = vmatprep.subr.mxu0 %v876_v14  ;;  %v276_v52 = vmul.f32 %v1422_v6, %v162_v18  ;;  %v275_v11 = vmul.f32 %v1420_v62, %v162_v18 }
 0x149   :  { %948 = vmatpush2.msra.mxu0 %v875_v32 }
 0x14a   :  { %v550_v8 = vadd.f32 %v486_v53, %v276_v52  ;;  %v549_v15 = vadd.f32 %v485_v47, %v275_v11  ;;  %v479_v11 = vmul.f32 %v1426_v10, %v1785_v23 }
 0x14b   :  { %v721_v49 = vpop.permute.xlu1 %720 }
 0x14c   :  { %v809_v20 = vadd.f32 %v721_v49, %v553_v1  ;;  %v810_v22 = vadd.f32 %v721_v49, %v554_v17  ;;  %v806_v34 = vadd.f32 %v711_v21, %v550_v8  ;;  %v805_v54 = vadd.f32 %v711_v21, %v549_v15  ;;  %v137_v1 = vpop.permute.xlu0 %136  ;;  %v1784_v49 = vld [vmem:[#allocation14_spill] sm:$0xff] }
 0x14d   :  { %v265_v51 = vmul.f32 %v1420_v62, %v137_v1  ;;  %v266_v15 = vmul.f32 %v1422_v6, %v137_v1 }
 0x14e   :  { %v873_v41 = vmax.f32 %v809_v20, 0.0  ;;  %v874_v12 = vmax.f32 %v810_v22, 0.0  ;;  %v870_v16 = vmax.f32 %v806_v34, 0.0  ;;  %v869_v58 = vmax.f32 %v805_v54, 0.0 }
 0x14f   :  { %v478_v20 = vmul.f32 %v1428_v19, %v1784_v49 }
 0x150   :  { %v379_v37 = vpop.permute.xlu1 %378  ;;  %949 = vmatprep.subr.mxu0 %v874_v12  ;;  %v477_v12 = vmul.f32 %v1426_v10, %v1784_v49  ;;  %v691_v50 = vpop.permute.xlu0 %690 }
 0x151   :  { %950 = vmatpush2.msra.mxu0 %v873_v41  ;;  %v483_v38 = vmul.f32 %v1426_v10, %v379_v37  ;;  %v484_v57 = vmul.f32 %v1428_v19, %v379_v37 }
 0x153   :  { %v547_v5 = vadd.f32 %v483_v38, %v273_v39  ;;  %v548_v61 = vadd.f32 %v484_v57, %v274_v7 }
 0x155   :  { %v716_v30 = vpop.permute.xlu1 %715 }
 0x156   :  { %v807_v26 = vadd.f32 %v716_v30, %v551_v24  ;;  %v808_v36 = vadd.f32 %v716_v30, %v552_v35 }
 0x158   :  { %v871_v55 = vmax.f32 %v807_v26, 0.0  ;;  %v872_v0 = vmax.f32 %v808_v36, 0.0 }
 0x15a   :  { %v375_v25 = vpop.permute.xlu1 %374  ;;  %951 = vmatprep.subr.mxu0 %v872_v0 }
 0x15b   :  { %952 = vmatpush2.msra.mxu0 %v871_v55  ;;  %v481_v59 = vmul.f32 %v1426_v10, %v375_v25  ;;  %v482_v4 = vmul.f32 %v1428_v19, %v375_v25 }
 0x15c   :  { %953 = vmatprep.subr.mxu0 %v870_v16 }
 0x15d   :  { %954 = vmatpush2.msra.mxu0 %v869_v58  ;;  %v545_v27 = vadd.f32 %v481_v59, %v271_v45  ;;  %v546_v48 = vadd.f32 %v482_v4, %v272_v43  ;;  %v896_v58 = vpop.permute.xlu0 %895 }
 0x15f   :  { %v147_v40 = vpop.permute.xlu1 %146 }
 0x160   :  { %v269_v22 = vmul.f32 %v1420_v62, %v147_v40  ;;  %v270_v52 = vmul.f32 %v1422_v6, %v147_v40 }
 0x162   :  { %v543_v47 = vadd.f32 %v479_v11, %v269_v22  ;;  %v544_v56 = vadd.f32 %v480_v42, %v270_v52 }
 0x163   :  { %v706_v13 = vpop.permute.xlu1 %705 }
 0x164   :  { %v803_v46 = vadd.f32 %v706_v13, %v547_v5  ;;  %v804_v3 = vadd.f32 %v706_v13, %v548_v61 }
 0x166   :  { %v867_v31 = vmax.f32 %v803_v46, 0.0  ;;  %v868_v63 = vmax.f32 %v804_v3, 0.0 }
 0x167   :  { %v142_v60 = vpop.permute.xlu1 %141 }
 0x168   :  { %955 = vmatprep.subr.mxu0 %v868_v63  ;;  %v268_v28 = vmul.f32 %v1422_v6, %v142_v60  ;;  %v267_v17 = vmul.f32 %v1420_v62, %v142_v60 }
 0x169   :  { %956 = vmatpush2.msra.mxu0 %v867_v31 }
 0x16a   :  { %v542_v53 = vadd.f32 %v478_v20, %v268_v28  ;;  %v541_v44 = vadd.f32 %v477_v12, %v267_v17 }
 0x16b   :  { %v701_v32 = vpop.permute.xlu1 %700 }
 0x16c   :  { %v801_v14 = vadd.f32 %v701_v32, %v545_v27  ;;  %v802_v18 = vadd.f32 %v701_v32, %v546_v48  ;;  %v798_v21 = vadd.f32 %v691_v50, %v542_v53  ;;  %v797_v30 = vadd.f32 %v691_v50, %v541_v44 }
 0x16e   :  { %v865_v2 = vmax.f32 %v801_v14, 0.0  ;;  %v866_v9 = vmax.f32 %v802_v18, 0.0  ;;  %v861_v25 = vmax.f32 %v797_v30, 0.0 }
 0x170   :  { %v363_v41 = vpop.permute.xlu1 %362  ;;  %957 = vmatprep.subr.mxu0 %v866_v9 }
 0x171   :  { %958 = vmatpush2.msra.mxu0 %v865_v2  ;;  %v475_v29 = vmul.f32 %v1426_v10, %v363_v41  ;;  %v476_v37 = vmul.f32 %v1428_v19, %v363_v41  ;;  %v862_v19 = vmax.f32 %v798_v21, 0.0 }
 0x173   :  { %v539_v34 = vadd.f32 %v475_v29, %v265_v51  ;;  %v540_v54 = vadd.f32 %v476_v37, %v266_v15 }
 0x175   :  { %v696_v8 = vpop.permute.xlu1 %695 }
 0x176   :  { %v799_v24 = vadd.f32 %v696_v8, %v543_v47  ;;  %v800_v35 = vadd.f32 %v696_v8, %v544_v56 }
 0x178   :  { %v863_v26 = vmax.f32 %v799_v24, 0.0  ;;  %v864_v36 = vmax.f32 %v800_v35, 0.0 }
 0x179   :  { %v686_v55 = vpop.permute.xlu1 %685 }
 0x17a   :  { %v795_v10 = vadd.f32 %v686_v55, %v539_v34  ;;  %v796_v0 = vadd.f32 %v686_v55, %v540_v54  ;;  %959 = vmatprep.subr.mxu0 %v864_v36 }
 0x17b   :  { %960 = vmatpush2.msra.mxu0 %v863_v26 }
 0x17c   :  { %v859_v62 = vmax.f32 %v795_v10, 0.0  ;;  %v860_v16 = vmax.f32 %v796_v0, 0.0  ;;  %961 = vmatprep.subr.mxu0 %v862_v19 }
 0x17d   :  { %962 = vmatpush2.msra.mxu0 %v861_v25 }
 0x17e   :  { %963 = vmatprep.subr.mxu0 %v860_v16 }
 0x17f   :  { %964 = vmatpush2.msra.mxu0 %v859_v62 }
 0x180   :  { %966 = vmatmul.mubr.f32.vlgmr.msra.gmra.mxu0 %v1645_v33 }
 0x240   :  { %v967_v6 = vpop.f32.mrf.mxu0 }
 0x241   :  { %v968_v57 = vadd.f32 %v967_v6, %v896_v58 }
 0x242   :  { %v969_v38 = vpop.f32.mrf.mxu0 }
 0x243   :  { %v970_v40 = vadd.f32 %v969_v38, %v896_v58 }
 0x245   :  { %v974_v39 = vcombine.low %v968_v57, %v970_v40 }
 0x247   :  { %976 = vst [vmem:[#allocation2] sm:$0xff] %v974_v39 }
 0x248   :  { %1037 = shalt.err (!%p1034_p4)
}
 0x249   :  { %986 = dma.vmem_to_hbm [thread:$0]  %s984_s3, 128, %s1742_s5, [#allocation3]  }
 0x24a   :  { %1046 = dma.done.wait [#allocation3], 128  }
 0x24b   :  { %1047 = vsyncadd [#allocation3], 4294967168 }
 0x24c   :  { %990 = vsyncpa [#allocation3], 1 }

</bundles_post_ra>
